<compile_context>
chip_gen: v5e
topology: v5e:2x2
jax: 0.10.0
libtpu: 0.0.40
codegen_flags: <defaults>
</compile_context>

<pallas_src>
import jax
import jax.numpy as jnp
from jax.experimental import pallas as pl
from jax.experimental.pallas import tpu as pltpu

IN_DIM = 16
HID_DIM = 164
OUT_DIM = 4

HID_PAD = 256    # lane-aligned hidden width (padded cols are exactly zero)
OUT_PAD = 128    # lane-dense MXU N width for the second matmul
OUT_STORE = 8    # columns actually written back to HBM (>= OUT_DIM)


# ---------------------------------------------------------------------------
# Kernels
# ---------------------------------------------------------------------------
def _mlp_body(x, w1_ref, b1_ref, w2_ref, b2_ref, o_ref):
    # x: (tb, 16), w1: (16, 256), b1: (1, 256), w2: (256, 128), b2: (1, 128)
    h = jnp.dot(x, w1_ref[...], preferred_element_type=jnp.float32) + b1_ref[...]
    h = jnp.maximum(h, 0.0)  # ReLU
    y = jnp.dot(h, w2_ref[...], preferred_element_type=jnp.float32) + b2_ref[...]
    # Compute at OUT_PAD = 128 (full MXU lanes) but write back only OUT_STORE
    # columns -> 16x less HBM writeback; padded columns are exactly zero anyway.
    o_ref[...] = y[:, :OUT_STORE].astype(o_ref.dtype)


def _mlp_kernel(x_ref, w1_ref, b1_ref, w2_ref, b2_ref, o_ref):
    """Dense-input path: x_ref is a (tb, 16) float block."""
    _mlp_body(x_ref[...], w1_ref, b1_ref, w2_ref, b2_ref, o_ref)


def _mlp_onehot_kernel(s_ref, w1_ref, b1_ref, w2_ref, b2_ref, o_ref):
    """FrozenLake path: s_ref is (tb, 1) int32 state indices; build the one-hot
    on-chip (4 B/row DMA instead of 64 B/row, no jax.nn.one_hot wrapper op)."""
    idx = s_ref[...]                                               # (tb, 1) i32
    cols = jax.lax.broadcasted_iota(jnp.int32, (idx.shape[0], IN_DIM), 1)
    x = (cols == idx).astype(jnp.float32)                          # (tb, 16)
    _mlp_body(x, w1_ref, b1_ref, w2_ref, b2_ref, o_ref)


# ---------------------------------------------------------------------------
# Parameter preparation (call ONCE and cache — hoisted out of the forward path)
# ---------------------------------------------------------------------------
def pad_params(w1, b1, w2, b2):
    """Zero-pad params to lane-aligned shapes; exact (padded entries are 0)."""
    w1 = jnp.asarray(w1, jnp.float32).reshape(IN_DIM, HID_DIM)
    b1 = jnp.asarray(b1, jnp.float32).reshape(1, HID_DIM)
    w2 = jnp.asarray(w2, jnp.float32).reshape(HID_DIM, OUT_DIM)
    b2 = jnp.asarray(b2, jnp.float32).reshape(1, OUT_DIM)
    w1p = jnp.zeros((IN_DIM, HID_PAD), jnp.float32).at[:, :HID_DIM].set(w1)
    b1p = jnp.zeros((1, HID_PAD), jnp.float32).at[:, :HID_DIM].set(b1)
    w2p = jnp.zeros((HID_PAD, OUT_PAD), jnp.float32).at[:HID_DIM, :OUT_DIM].set(w2)
    b2p = jnp.zeros((1, OUT_PAD), jnp.float32).at[:, :OUT_DIM].set(b2)
    return w1p, b1p, w2p, b2p


# ---------------------------------------------------------------------------
# Tiling
# ---------------------------------------------------------------------------
def _tiling(b):
    """Pick (tile, padded_batch). Tile up to 512 rows; keep >=2 grid steps
    when the batch allows so v7x's second TensorCore gets work."""
    b8 = max(8, ((b + 7) // 8) * 8)          # sublane-aligned batch
    tb = min(512, b8)
    if b8 > 8 and b8 // tb < 2:
        tb = max(8, ((b8 // 2 + 7) // 8) * 8)
    b_pad = pl.cdiv(b8, tb) * tb
    return tb, b_pad


def _call_mlp(kernel, x_arr, x_block, padded_params, b_pad, tb):
    w1p, b1p, w2p, b2p = padded_params
    return pl.pallas_call(
        kernel,
        out_shape=jax.ShapeDtypeStruct((b_pad, OUT_STORE), jnp.float32),
        grid=(b_pad // tb,),
        in_specs=[
            # activations / indices: one block per grid step
            pl.BlockSpec(x_block, lambda i: (i, 0)),
            # weights & biases: constant index_maps -> VMEM-resident across steps
            pl.BlockSpec((IN_DIM, HID_PAD), lambda i: (0, 0)),
            pl.BlockSpec((1, HID_PAD), lambda i: (0, 0)),
            pl.BlockSpec((HID_PAD, OUT_PAD), lambda i: (0, 0)),
            pl.BlockSpec((1, OUT_PAD), lambda i: (0, 0)),
        ],
        out_specs=pl.BlockSpec((tb, OUT_STORE), lambda i: (i, 0)),
        compiler_params=pltpu.CompilerParams(
            dimension_semantics=("parallel",)),
    )(x_arr, w1p, b1p, w2p, b2p)


# ---------------------------------------------------------------------------
# Forward wrappers
# ---------------------------------------------------------------------------
def network_forward_batched(xb, padded_params):
    """Batched forward: xb is (B, 16) float (or anything reshapeable to it)."""
    xb = jnp.asarray(xb, jnp.float32).reshape(-1, IN_DIM)
    B = xb.shape[0]
    tb, b_pad = _tiling(B)
    if b_pad != B:                       # skip the pad when already tile-aligned
        xb = jnp.pad(xb, ((0, b_pad - B), (0, 0)))
    out = _call_mlp(_mlp_kernel, xb, (tb, IN_DIM), padded_params, b_pad, tb)
    return out[:B, :OUT_DIM]


def network_forward_states(states, padded_params):
    """FrozenLake fast path: integer state indices, one-hot built in-kernel."""
    states = jnp.asarray(states, jnp.int32).reshape(-1, 1)
    B = states.shape[0]
    tb, b_pad = _tiling(B)
    if b_pad != B:
        states = jnp.pad(states, ((0, b_pad - B), (0, 0)))
    out = _call_mlp(_mlp_onehot_kernel, states, (tb, 1), padded_params, b_pad, tb)
    return out[:B, :OUT_DIM]


def network_forward(x, padded_params):
    """Exact semantics of Network.forward: flatten to (1, 16), return (1, 4)."""
    x = jnp.asarray(x, jnp.float32).reshape(1, IN_DIM)
    return network_forward_batched(x, padded_params)


def init_params(key):
    """Deterministic init mimicking torch nn.Linear default (+/- 1/sqrt(fan_in))."""
    k1, k2, k3, k4 = jax.random.split(key, 4)
    bound1 = 1.0 / jnp.sqrt(jnp.float32(IN_DIM))
    bound2 = 1.0 / jnp.sqrt(jnp.float32(HID_DIM))
    # Stored as (in, out) so the kernel does x @ W directly.
    w1 = jax.random.uniform(k1, (IN_DIM, HID_DIM), jnp.float32, -bound1, bound1)
    b1 = jax.random.uniform(k2, (1, HID_DIM), jnp.float32, -bound1, bound1)
    w2 = jax.random.uniform(k3, (HID_DIM, OUT_DIM), jnp.float32, -bound2, bound2)
    b2 = jax.random.uniform(k4, (1, OUT_DIM), jnp.float32, -bound2, bound2)
    return w1, b1, w2, b2


if __name__ == "__main__":
    key = jax.random.PRNGKey(0)
    pkey, xkey = jax.random.split(key)
    w1, b1, w2, b2 = init_params(pkey)

    # Pad ONCE and reuse across calls (hoisted out of the per-forward path).
    padded = jax.block_until_ready(pad_params(w1, b1, w2, b2))

    fwd_single = jax.jit(network_forward)
    fwd_batch = jax.jit(network_forward_batched)
    fwd_states = jax.jit(network_forward_states)

    # --- Single-state path (matches the torch module's reshape(1, 16)) ---
    state = 5
    x = jnp.zeros((IN_DIM,), jnp.float32).at[state].set(1.0)
    out1 = jax.block_until_ready(fwd_single(x, padded))
    ref1 = jnp.maximum(x.reshape(1, IN_DIM) @ w1 + b1, 0.0) @ w2 + b2
    assert out1.shape == (1, OUT_DIM)
    assert jnp.allclose(out1, ref1, atol=1e-5, rtol=1e-5), (out1, ref1)

    # --- Batched dense path: 8 one-hot FrozenLake states, one kernel launch ---
    B = 8
    states = jax.random.randint(xkey, (B,), 0, IN_DIM)
    xb = jax.nn.one_hot(states, IN_DIM, dtype=jnp.float32)
    outb = jax.block_until_ready(fwd_batch(xb, padded))
    refb = jnp.maximum(xb @ w1 + b1, 0.0) @ w2 + b2
    assert outb.shape == (B, OUT_DIM)
    assert jnp.allclose(outb, refb, atol=1e-5, rtol=1e-5), (outb, refb)

    # --- Index fast path: same states, one-hot built inside the kernel ---
    outs = jax.block_until_ready(fwd_states(states, padded))
    assert outs.shape == (B, OUT_DIM)
    assert jnp.allclose(outs, refb, atol=1e-5, rtol=1e-5), (outs, refb)

    print("KERNEL_OK")
</pallas_src>

<mosaic_0001>
module attributes {stable_mosaic.version = 11 : i64} {
  func.func @_mlp_kernel(%arg0: i32, %arg1: memref<8x16xf32, #tpu.memory_space<vmem>>, %arg2: memref<16x256xf32, #tpu.memory_space<vmem>>, %arg3: memref<1x256xf32, #tpu.memory_space<vmem>>, %arg4: memref<256x128xf32, #tpu.memory_space<vmem>>, %arg5: memref<1x128xf32, #tpu.memory_space<vmem>>, %arg6: memref<8x8xf32, #tpu.memory_space<vmem>>) attributes {dimension_semantics = [#tpu.dimension_semantics<parallel>], iteration_bounds = array<i64: 1>, scalar_prefetch = 0 : i64, scratch_operands = 0 : i64, tpu.core_type = #tpu.core_type<tc>, window_params = [{transform_indices = @transform_0, window_bounds = array<i64: 8, 16>}, {pipeline_mode = #tpu.pipeline_mode<synchronous>, transform_indices = @transform_1, window_bounds = array<i64: 16, 256>}, {pipeline_mode = #tpu.pipeline_mode<synchronous>, transform_indices = @transform_2, window_bounds = array<i64: 1, 256>}, {pipeline_mode = #tpu.pipeline_mode<synchronous>, transform_indices = @transform_3, window_bounds = array<i64: 256, 128>}, {pipeline_mode = #tpu.pipeline_mode<synchronous>, transform_indices = @transform_4, window_bounds = array<i64: 1, 128>}, {transform_indices = @transform_5, window_bounds = array<i64: 8, 8>}]} {
    %c0 = arith.constant 0 : index
    %c0_0 = arith.constant 0 : index
    %0 = vector.load %arg1[%c0, %c0_0] : memref<8x16xf32, #tpu.memory_space<vmem>>, vector<8x16xf32>
    %c0_1 = arith.constant 0 : index
    %c0_2 = arith.constant 0 : index
    %1 = vector.load %arg2[%c0_1, %c0_2] : memref<16x256xf32, #tpu.memory_space<vmem>>, vector<16x256xf32>
    %cst = arith.constant dense<0.000000e+00> : vector<8x256xf32>
    %2 = tpu.matmul %0, %1, %cst {dimension_numbers = #tpu.dot_dimension_numbers<[1], [0], [0], [1], [0, 0, 1, 1], [], []>} : vector<8x16xf32>, vector<16x256xf32>, vector<8x256xf32> -> vector<8x256xf32>
    %c0_3 = arith.constant 0 : index
    %c0_4 = arith.constant 0 : index
    %3 = vector.load %arg3[%c0_3, %c0_4] : memref<1x256xf32, #tpu.memory_space<vmem>>, vector<1x256xf32>
    %4 = vector.broadcast %3 : vector<1x256xf32> to vector<8x256xf32>
    %5 = arith.addf %2, %4 : vector<8x256xf32>
    %cst_5 = arith.constant 0.000000e+00 : f32
    %6 = vector.broadcast %cst_5 : f32 to vector<8x256xf32>
    %7 = arith.maximumf %5, %6 : vector<8x256xf32>
    %c0_6 = arith.constant 0 : index
    %c0_7 = arith.constant 0 : index
    %8 = vector.load %arg4[%c0_6, %c0_7] : memref<256x128xf32, #tpu.memory_space<vmem>>, vector<256x128xf32>
    %cst_8 = arith.constant dense<0.000000e+00> : vector<8x128xf32>
    %9 = tpu.matmul %7, %8, %cst_8 {dimension_numbers = #tpu.dot_dimension_numbers<[1], [0], [0], [1], [0, 0, 1, 1], [], []>} : vector<8x256xf32>, vector<256x128xf32>, vector<8x128xf32> -> vector<8x128xf32>
    %c0_9 = arith.constant 0 : index
    %c0_10 = arith.constant 0 : index
    %10 = vector.load %arg5[%c0_9, %c0_10] : memref<1x128xf32, #tpu.memory_space<vmem>>, vector<1x128xf32>
    %11 = vector.broadcast %10 : vector<1x128xf32> to vector<8x128xf32>
    %12 = arith.addf %9, %11 : vector<8x128xf32>
    %13 = vector.extract_strided_slice %12 {offsets = [0, 0], sizes = [8, 8], strides = [1, 1]} : vector<8x128xf32> to vector<8x8xf32>
    %c0_11 = arith.constant 0 : index
    %c0_12 = arith.constant 0 : index
    %14 = vector.load %arg6[%c0_11, %c0_12] : memref<8x8xf32, #tpu.memory_space<vmem>>, vector<8x8xf32>
    tpu.vector_store %arg6[%c0_11, %c0_12], %13 {strides = array<i32>} : memref<8x8xf32, #tpu.memory_space<vmem>>, vector<8x8xf32>,
    return
  }
  func.func @transform_0(%arg0: i32) -> (i32, i32) {
    %c0_i32 = arith.constant 0 : i32
    %c0_i32_0 = arith.constant 0 : i32
    return %arg0, %c0_i32 : i32, i32
  }
  func.func @transform_1(%arg0: i32) -> (i32, i32) {
    %c0_i32 = arith.constant 0 : i32
    %c0_i32_0 = arith.constant 0 : i32
    %c0_i32_1 = arith.constant 0 : i32
    return %c0_i32, %c0_i32_0 : i32, i32
  }
  func.func @transform_2(%arg0: i32) -> (i32, i32) {
    %c0_i32 = arith.constant 0 : i32
    %c0_i32_0 = arith.constant 0 : i32
    %c0_i32_1 = arith.constant 0 : i32
    return %c0_i32, %c0_i32_0 : i32, i32
  }
  func.func @transform_3(%arg0: i32) -> (i32, i32) {
    %c0_i32 = arith.constant 0 : i32
    %c0_i32_0 = arith.constant 0 : i32
    %c0_i32_1 = arith.constant 0 : i32
    return %c0_i32, %c0_i32_0 : i32, i32
  }
  func.func @transform_4(%arg0: i32) -> (i32, i32) {
    %c0_i32 = arith.constant 0 : i32
    %c0_i32_0 = arith.constant 0 : i32
    %c0_i32_1 = arith.constant 0 : i32
    return %c0_i32, %c0_i32_0 : i32, i32
  }
  func.func @transform_5(%arg0: i32) -> (i32, i32) {
    %c0_i32 = arith.constant 0 : i32
    %c0_i32_0 = arith.constant 0 : i32
    return %arg0, %c0_i32 : i32, i32
  }
}

</mosaic_0001>

<bundles_post_ra>
// kernel: network_forward.1
= control target key start
LH: loop header
LB: loop body
LE: loop exit
PB: predicated region body
PF: predicated region fallthrough
CT: control target
= control target key end

     0   :  { %10 = vsyncpa [#allocation3], 0  ;;  %s308_s0 = inlined_call_operand.vmem [shape: f32[8,16], index: 0, kind: input, shape index: {}]   ;;  %s309_s1 = inlined_call_operand.hbm [shape: f32[16,256], index: 1, kind: input, shape index: {}]   ;;  %s310_s2 = inlined_call_operand.vmem [shape: f32[1,256], index: 2, kind: input, shape index: {}]   ;;  %s311_s3 = inlined_call_operand.hbm [shape: f32[256,128], index: 3, kind: input, shape index: {}]   ;;  %s312_s4 = inlined_call_operand.vmem [shape: f32[1,128], index: 4, kind: input, shape index: {}]   ;;  %s313_s5 = inlined_call_operand.vmem [shape: f32[8,8], index: 5, kind: output, shape index: {}]  }
   0x1   :  { %s18_s20 = sshll.u32 %s309_s1, 4  ;;  %s19_s20 = int_to_ptr.hbm [resolvable:$true] %s18_s20 }
   0x2   :  { %11 = vsyncpa [#allocation5], 0  ;;  %s254_s21 = smov [#allocation2]   ;;  %s33_s25 = sshll.u32 %s311_s3, 4  ;;  %s34_s25 = int_to_ptr.hbm [resolvable:$true] %s33_s25 }
   0x3   :  { %s20_s22 = sshll.u32 %s254_s21, 4  ;;  %s255_s26 = smov 256   ;;  %s21_s22 = int_to_ptr.vmem [resolvable:$true] %s20_s22 }
   0x4   :  { %s256_s27 = smov 16   ;;  %s257_s28 = smov [#allocation4]  }
   0x5   :  { %26 = dma.hbm_to_vmem [thread:$0]  %s19_s20, 512, %s21_s22, [#allocation3], %s255_s26, %s255_s26, %s256_s27  }
   0x6   :  { %s35_s29 = sshll.u32 %s257_s28, 4  ;;  %s258_s30 = smov 128   ;;  %s36_s29 = int_to_ptr.vmem [resolvable:$true] %s35_s29 }
   0x7   :  { %s259_s6 = smov 8  }
   0x8   :  { %41 = dma.hbm_to_vmem [thread:$0]  %s34_s25, 4096, %s36_s29, [#allocation5], %s258_s30, %s258_s30, %s259_s6  }
   0x9   :  { %250 = dma.done.wait [#allocation3], 512  }
   0xa   :  { %251 = vsyncadd [#allocation3], 4294966784 }
   0xb   :  { %252 = dma.done.wait [#allocation5], 4096  }
   0xc   :  { %253 = vsyncadd [#allocation5], 4294963200  ;;  %v55_v0 = vld [vmem:[#allocation2 + $0x10] sm:$0xff]  ;;  %v53_v1 = vld [vmem:[#allocation2] sm:$0xff]  ;;  %vm63_vm0 = vcmask 130048   ;;  %vm185_vm1 = vcmask 64512  }
   0xd   :  { %v56_v2 = vld [vmem:[#allocation2 + $0x18] sm:$0xff]  ;;  %81 = vmatpush.msra.mxu0 %v55_v0  ;;  %v52_v3 = vld [vmem:[%s308_s0] sm:$0xff]  ;;  %v54_v4 = vld [vmem:[#allocation2 + $0x8] sm:$0xff] }
   0xe   :  { %101 = vmatpush.msra.mxu1 %v56_v2  ;;  %v124_v5 = vld [vmem:[#allocation4 + $0x78] sm:$0xff]  ;;  %v123_v6 = vld [vmem:[#allocation4 + $0x70] sm:$0xff]  ;;  %v122_v8 = vld [vmem:[#allocation4 + $0x68] sm:$0xff] }
   0xf   :  { %145 = vmatpush.msra.mxu2 %v124_v5  ;;  %v140_v7 = vld [vmem:[#allocation4 + $0xf8] sm:$0xff]  ;;  %82 = vmatpush.msra.mxu0 %v53_v1  ;;  %v139_v9 = vld [vmem:[#allocation4 + $0xf0] sm:$0xff]  ;;  %v121_v10 = vld [vmem:[#allocation4 + $0x60] sm:$0xff] }
  0x10   :  { %102 = vmatpush.msra.mxu1 %v54_v4  ;;  %193 = vmatmul.msk.f32.vlgmr.msra.gmra.mxu0 %vm63_vm0, %v52_v3  ;;  %v138_v11 = vld [vmem:[#allocation4 + $0xe8] sm:$0xff]  ;;  %v120_v12 = vld [vmem:[#allocation4 + $0x58] sm:$0xff]  ;;  %v137_v13 = vld [vmem:[#allocation4 + $0xe0] sm:$0xff] }
  0x11   :  { %194 = vmatmul.msk.f32.vlgmr.msra.gmra.mxu1 %vm63_vm0, %v52_v3  ;;  %146 = vmatpush.msra.mxu2 %v123_v6  ;;  %v119_v14 = vld [vmem:[#allocation4 + $0x50] sm:$0xff]  ;;  %v136_v15 = vld [vmem:[#allocation4 + $0xd8] sm:$0xff]  ;;  %v118_v16 = vld [vmem:[#allocation4 + $0x48] sm:$0xff] }
  0x12   :  { %165 = vmatpush.msra.mxu3 %v140_v7  ;;  %v135_v17 = vld [vmem:[#allocation4 + $0xd0] sm:$0xff]  ;;  %v117_v18 = vld [vmem:[#allocation4 + $0x40] sm:$0xff]  ;;  %v134_v19 = vld [vmem:[#allocation4 + $0xc8] sm:$0xff] }
  0x13   :  { %147 = vmatpush.msra.mxu2 %v122_v8  ;;  %v116_v20 = vld [vmem:[#allocation4 + $0x38] sm:$0xff]  ;;  %v133_v21 = vld [vmem:[#allocation4 + $0xc0] sm:$0xff]  ;;  %v115_v22 = vld [vmem:[#allocation4 + $0x30] sm:$0xff] }
  0x14   :  { %166 = vmatpush.msra.mxu3 %v139_v9  ;;  %v132_v23 = vld [vmem:[#allocation4 + $0xb8] sm:$0xff]  ;;  %v114_v24 = vld [vmem:[#allocation4 + $0x28] sm:$0xff]  ;;  %v131_v25 = vld [vmem:[#allocation4 + $0xb0] sm:$0xff] }
  0x15   :  { %148 = vmatpush.msra.mxu2 %v121_v10  ;;  %v113_v26 = vld [vmem:[#allocation4 + $0x20] sm:$0xff]  ;;  %v130_v27 = vld [vmem:[#allocation4 + $0xa8] sm:$0xff]  ;;  %v112_v28 = vld [vmem:[#allocation4 + $0x18] sm:$0xff] }
  0x16   :  { %167 = vmatpush.msra.mxu3 %v138_v11  ;;  %v129_v29 = vld [vmem:[#allocation4 + $0xa0] sm:$0xff]  ;;  %v111_v30 = vld [vmem:[#allocation4 + $0x10] sm:$0xff]  ;;  %v128_v31 = vld [vmem:[#allocation4 + $0x98] sm:$0xff] }
  0x17   :  { %149 = vmatpush.msra.mxu2 %v120_v12  ;;  %v110_v32 = vld [vmem:[#allocation4 + $0x8] sm:$0xff]  ;;  %v127_v33 = vld [vmem:[#allocation4 + $0x90] sm:$0xff]  ;;  %v109_v34 = vld [vmem:[#allocation4] sm:$0xff] }
  0x18   :  { %168 = vmatpush.msra.mxu3 %v137_v13  ;;  %v126_v35 = vld [vmem:[#allocation4 + $0x88] sm:$0xff]  ;;  %v125_v36 = vld [vmem:[#allocation4 + $0x80] sm:$0xff] }
  0x19   :  { %150 = vmatpush.msra.mxu2 %v119_v14  ;;  %v57_v37 = vld [vmem:[%s310_s2] sm:$0x3] }
  0x1a   :  { %169 = vmatpush.msra.mxu3 %v136_v15  ;;  %v59_v38 = vperm.slane %v57_v37, 0  ;;  %v60_v39 = vperm.slane %v57_v37, 1  ;;  %v201_v46 = vld [vmem:[%s312_s4] ss:$0 sm:$0xff] }
  0x1b   :  { %151 = vmatpush.msra.mxu2 %v118_v16 }
  0x1c   :  { %170 = vmatpush.msra.mxu3 %v135_v17 }
  0x1d   :  { %152 = vmatpush.msra.mxu2 %v117_v18 }
  0x1e   :  { %171 = vmatpush.msra.mxu3 %v134_v19 }
  0x1f   :  { %153 = vmatpush.msra.mxu2 %v116_v20 }
  0x20   :  { %172 = vmatpush.msra.mxu3 %v133_v21 }
  0x21   :  { %154 = vmatpush.msra.mxu2 %v115_v22 }
  0x22   :  { %173 = vmatpush.msra.mxu3 %v132_v23 }
  0x23   :  { %155 = vmatpush.msra.mxu2 %v114_v24 }
  0x24   :  { %174 = vmatpush.msra.mxu3 %v131_v25 }
  0x25   :  { %156 = vmatpush.msra.mxu2 %v113_v26 }
  0x26   :  { %175 = vmatpush.msra.mxu3 %v130_v27 }
  0x27   :  { %157 = vmatpush.msra.mxu2 %v112_v28 }
  0x28   :  { %176 = vmatpush.msra.mxu3 %v129_v29 }
  0x29   :  { %158 = vmatpush.msra.mxu2 %v111_v30 }
  0x2a   :  { %177 = vmatpush.msra.mxu3 %v128_v31 }
  0x2b   :  { %159 = vmatpush.msra.mxu2 %v110_v32 }
  0x2c   :  { %178 = vmatpush.msra.mxu3 %v127_v33 }
  0x2d   :  { %160 = vmatpush.msra.mxu2 %v109_v34 }
  0x2e   :  { %179 = vmatpush.msra.mxu3 %v126_v35 }
  0x30   :  { %180 = vmatpush.msra.mxu3 %v125_v36 }
  0x8d   :  { %v84_v40 = vpop.f32.mrf.mxu0 }
  0x8e   :  { %v104_v41 = vpop.f32.mrf.mxu1  ;;  %v85_v42 = vadd.f32 %v84_v40, %v59_v38 }
  0x8f   :  { %v105_v43 = vadd.f32 %v104_v41, %v60_v39 }
  0x90   :  { %v107_v44 = vmax.f32 %v85_v42, 0.0 }
  0x91   :  { %v108_v45 = vmax.f32 %v105_v43, 0.0 }
  0x92   :  { %161 = vmatmul.f32.vlgmr.msra.gmra.mxu2 %v107_v44 }
  0x93   :  { %181 = vmatmul.f32.vlgmr.msra.gmra.mxu3 %v108_v45 }
 0x115   :  { %v162_v47 = vpop.f32.mrf.mxu2 }
 0x116   :  { %v182_v48 = vpop.f32.mrf.mxu3  ;;  %v163_v49 = vadd.f32 %v201_v46, %v162_v47 }
 0x118   :  { %v183_v50 = vadd.f32 %v182_v48, %v163_v49 }
 0x11a   :  { %186 = vst.msk [vmem:[%s313_s5] sm:$0xff] %vm185_vm1, %v183_v50 }
 0x11b   :  { %191 = vsyncpa [#allocation3], 1 }
 0x11c   :  { %192 = vsyncpa [#allocation5], 1 }

</bundles_post_ra>
